<compile_context>
chip_gen: v7x
topology: tpu7x:2x2x1
jax: 0.10.0
libtpu: 0.0.40
codegen_flags: <defaults>
</compile_context>

<pallas_src>
import jax
import jax.numpy as jnp
from jax import lax
from jax.experimental import pallas as pl
from jax.experimental.pallas import tpu as pltpu


# ---------------------------------------------------------------------------
# Pallas kernel: batched masked attention pooling (BB batch rows per step)
# ---------------------------------------------------------------------------
def _smm_q_kernel(len_ref, q_ref, wkt_ref, out_ref):
    q = q_ref[...]                                    # (BB, T, D)
    BB, T, D = q.shape
    lens = len_ref[...]                               # (BB, 1) int32

    # mask_fill(Q, mask_(Q, Q_len), 0): zero rows with t >= len[b].
    # One vectorized iota-compare over the whole (BB, T, D) slab.
    t_idx = lax.broadcasted_iota(jnp.int32, (BB, T, 1), 1)
    mask = t_idx < lens[:, None, :]                   # (BB, T, 1)
    maskQ = jnp.where(mask, q, 0.0)                   # (BB, T, D), dtype of q

    # k(masked_Q): one MXU matmul over all BB*T rows, Wk pre-transposed (D, 2).
    scores = jnp.dot(
        maskQ.reshape(BB * T, D), wkt_ref[...],
        preferred_element_type=jnp.float32,
    ).reshape(BB, T, 2)

    # softmax over the time dim (padded rows included with score exactly 0 —
    # matches the torch reference; do NOT mask scores to -inf).
    m = jnp.max(scores, axis=1, keepdims=True)        # (BB, 1, 2)
    e = jnp.exp(scores - m)                           # (BB, T, 2)
    l = jnp.sum(e, axis=1, keepdims=True)             # (BB, 1, 2)
    alpha = e * pl.reciprocal(l, approx=True)         # (BB, T, 2)

    # Q_ = bmm(alpha^T, masked_Q) then max over the 2 slots — done on the VPU
    # as two alpha-weighted sublane sums (slot dim is only 2).
    mq = maskQ.astype(jnp.float32)
    q0 = jnp.sum(alpha[:, :, 0:1] * mq, axis=1)       # (BB, D)
    q1 = jnp.sum(alpha[:, :, 1:2] * mq, axis=1)       # (BB, D)
    out_ref[...] = jnp.maximum(q0, q1).astype(out_ref.dtype)


def smm_q_attend(Q, lengths, Wk, *, block_b=None, q_dtype=jnp.float32):
    """Q: (B, T, 2H), lengths: (B,) int, Wk: (2, 2H) -> (B, 2H) float32.

    q_dtype=jnp.bfloat16 can be used on v6e/v7x to halve HBM DMA bytes (MXU
    operands bf16, f32 accumulation); default float32 is exact and v5e-safe.
    """
    B, T, D = Q.shape

    if block_b is None:
        # Aim for >= 256 MXU rows (BB*T) per grid step, but don't pad the
        # batch beyond its next multiple of 8 (sublane alignment).
        bb = -(-256 // T)
        bb = ((bb + 7) // 8) * 8
        bb = min(bb, ((B + 7) // 8) * 8)
    else:
        bb = block_b
    bb = max(8, bb)
    B_pad = ((B + bb - 1) // bb) * bb

    # Pad batch; padded rows have length 0 -> fully masked -> output row 0.
    Qp = jnp.pad(Q.astype(q_dtype), ((0, B_pad - B), (0, 0), (0, 0)))
    lens2d = jnp.pad(lengths.astype(jnp.int32), (0, B_pad - B)).reshape(B_pad, 1)
    wk_t = jnp.transpose(Wk.astype(q_dtype))          # (2H, 2), one-time XLA op

    out = pl.pallas_call(
        _smm_q_kernel,
        out_shape=jax.ShapeDtypeStruct((B_pad, D), jnp.float32),
        grid_spec=pltpu.PrefetchScalarGridSpec(
            num_scalar_prefetch=0,
            grid=(B_pad // bb,),
            in_specs=[
                pl.BlockSpec((bb, 1), lambda g: (g, 0)),      # lengths
                pl.BlockSpec((bb, T, D), lambda g: (g, 0, 0)),  # Q slab
                pl.BlockSpec((D, 2), lambda g: (0, 0)),         # Wk^T (resident)
            ],
            out_specs=pl.BlockSpec((bb, D), lambda g: (g, 0)),  # lane-dense
        ),
        compiler_params=pltpu.CompilerParams(
            dimension_semantics=("parallel",)),
    )(lens2d, Qp, wk_t)
    return out[:B]


# ---------------------------------------------------------------------------
# BiLSTM glue (plain JAX) — reproduces packed-sequence semantics for Q
# ---------------------------------------------------------------------------
def _lstm_dir(x, h0, c0, Wih, Whh, bih, bhh):
    """x: (B, T, E). Returns hidden states (B, T, H). PyTorch gate order i,f,g,o.

    Input projection is hoisted out of the scan (one batched matmul) so the
    scan body only does h @ Whh.T + gates_x[t].
    """
    gates_x = jnp.einsum("bte,ge->btg", x, Wih) + (bih + bhh)   # (B, T, 4H)

    def step(carry, gx_t):
        h, c = carry
        gates = gx_t + h @ Whh.T                     # (B, 4H)
        i, f, g, o = jnp.split(gates, 4, axis=-1)
        i = jax.nn.sigmoid(i)
        f = jax.nn.sigmoid(f)
        g = jnp.tanh(g)
        o = jax.nn.sigmoid(o)
        c = f * c + i * g
        h = o * jnp.tanh(c)
        return (h, c), h

    (_, _), hs = lax.scan(step, (h0, c0), jnp.swapaxes(gates_x, 0, 1))
    return jnp.swapaxes(hs, 0, 1)                    # (B, T, H)


def _reverse_valid(x, lengths):
    """Per-batch reverse of the first `len` timesteps; positions >= len -> 0.
    Applying it twice restores the original valid prefix (packed-seq reverse)."""
    T = x.shape[1]
    idx = lengths[:, None] - 1 - jnp.arange(T)[None, :]     # (B, T)
    valid = idx >= 0
    idx = jnp.clip(idx, 0, T - 1)
    gathered = jnp.take_along_axis(
        x, jnp.broadcast_to(idx[:, :, None], x.shape), axis=1)
    return jnp.where(valid[:, :, None], gathered, 0.0)


def bilstm_forward(tokens, lengths, params):
    """tokens: (B, T) int32, lengths: (B,) int32. Returns Q: (B, T, 2H)."""
    B = tokens.shape[0]
    H = params["init_h"].shape[1]
    x_emb = params["emb"][tokens]                    # (B, T, E); dropout p=0 -> no-op

    h0f = jnp.broadcast_to(params["init_h"][0], (B, H))
    c0f = jnp.broadcast_to(params["init_c"][0], (B, H))
    h0b = jnp.broadcast_to(params["init_h"][1], (B, H))
    c0b = jnp.broadcast_to(params["init_c"][1], (B, H))

    h_fwd = _lstm_dir(x_emb, h0f, c0f,
                      params["Wih_f"], params["Whh_f"],
                      params["bih_f"], params["bhh_f"])

    x_rev = _reverse_valid(x_emb, lengths)           # packed-seq reverse direction
    h_bwd_rev = _lstm_dir(x_rev, h0b, c0b,
                          params["Wih_b"], params["Whh_b"],
                          params["bih_b"], params["bhh_b"])
    h_bwd = _reverse_valid(h_bwd_rev, lengths)       # map back to original positions

    return jnp.concatenate([h_fwd, h_bwd], axis=-1)  # (B, T, 2H)


def smm_q_forward(tokens, lengths, params):
    Q = bilstm_forward(tokens, lengths, params)      # unsort_out, (B, T, 2H)
    return smm_q_attend(Q, lengths, params["Wk"])    # (B, 2H)


# ---------------------------------------------------------------------------
# Deterministic parameter / input construction + run
# ---------------------------------------------------------------------------
if __name__ == "__main__":
    key = jax.random.PRNGKey(0)
    B, T = 2, 8                 # batch, max sequence length
    vocab, E, H = 20, 32, 16    # vocab size, emb_dim, hidden_dim  (2H = 32)

    keys = jax.random.split(key, 13)

    def u(k, shape, a):
        return jax.random.uniform(k, shape, jnp.float32, minval=-a, maxval=a)

    lengths = jnp.array([8, 5], dtype=jnp.int32)
    tokens = jax.random.randint(keys[0], (B, T), 1, vocab, dtype=jnp.int32)
    # np.pad with constant 0 -> padded positions are token id 0
    tokens = jnp.where(jnp.arange(T)[None, :] < lengths[:, None], tokens, 0)

    params = {
        "emb":   jax.random.normal(keys[1], (vocab, E), jnp.float32) * 0.1,
        "Wih_f": u(keys[2], (4 * H, E), 0.1),
        "Whh_f": u(keys[3], (4 * H, H), 0.1),
        "bih_f": u(keys[4], (4 * H,), 0.1),
        "bhh_f": u(keys[5], (4 * H,), 0.1),
        "Wih_b": u(keys[6], (4 * H, E), 0.1),
        "Whh_b": u(keys[7], (4 * H, H), 0.1),
        "bih_b": u(keys[8], (4 * H,), 0.1),
        "bhh_b": u(keys[9], (4 * H,), 0.1),
        "init_h": u(keys[10], (2, H), 0.01),
        "init_c": u(keys[11], (2, H), 0.01),
        "Wk":    u(keys[12], (2, 2 * H), 0.1),       # nn.Linear(2H, 2, bias=False)
    }

    q_out = smm_q_forward(tokens, lengths, params)   # (B, 2H)
    jax.block_until_ready(q_out)
    assert q_out.shape == (B, 2 * H)
    print("KERNEL_OK")
</pallas_src>

<mosaic_0001>
module attributes {stable_mosaic.version = 11 : i64} {
  func.func @_smm_q_kernel(%arg0: i32, %arg1: memref<8x1xi32, #tpu.memory_space<vmem>>, %arg2: memref<8x8x32xf32, #tpu.memory_space<vmem>>, %arg3: memref<32x2xf32, #tpu.memory_space<vmem>>, %arg4: memref<8x32xf32, #tpu.memory_space<vmem>>) attributes {dimension_semantics = [#tpu.dimension_semantics<parallel>], iteration_bounds = array<i64: 1>, scalar_prefetch = 0 : i64, scratch_operands = 0 : i64, tpu.core_type = #tpu.core_type<tc>, window_params = [{transform_indices = @transform_0, window_bounds = array<i64: 8, 1>}, {transform_indices = @transform_1, window_bounds = array<i64: 8, 8, 32>}, {pipeline_mode = #tpu.pipeline_mode<synchronous>, transform_indices = @transform_2, window_bounds = array<i64: 32, 2>}, {transform_indices = @transform_3, window_bounds = array<i64: 8, 32>}]} {
    %c0 = arith.constant 0 : index
    %c0_0 = arith.constant 0 : index
    %c0_1 = arith.constant 0 : index
    %0 = vector.load %arg2[%c0, %c0_0, %c0_1] : memref<8x8x32xf32, #tpu.memory_space<vmem>>, vector<8x8x32xf32>
    %c0_2 = arith.constant 0 : index
    %c0_3 = arith.constant 0 : index
    %1 = vector.load %arg1[%c0_2, %c0_3] : memref<8x1xi32, #tpu.memory_space<vmem>>, vector<8x1xi32>
    %2 = tpu.iota {dimensions = array<i32: 1>} : vector<8x8x1xi32>
    %3 = vector.shape_cast %1 : vector<8x1xi32> to vector<8x1x1xi32>
    %4 = vector.broadcast %3 : vector<8x1x1xi32> to vector<8x8x1xi32>
    %5 = arith.cmpi slt, %2, %4 : vector<8x8x1xi32>
    %cst = arith.constant 0.000000e+00 : f32
    %6 = vector.shape_cast %5 : vector<8x8x1xi1> to vector<8x8x1xi1>
    %7 = vector.broadcast %6 : vector<8x8x1xi1> to vector<8x8x32xi1>
    %8 = vector.broadcast %cst : f32 to vector<8x8x32xf32>
    %9 = arith.select %7, %0, %8 : vector<8x8x32xi1>, vector<8x8x32xf32>
    %10 = vector.shape_cast %9 : vector<8x8x32xf32> to vector<64x32xf32>
    %c0_4 = arith.constant 0 : index
    %c0_5 = arith.constant 0 : index
    %11 = vector.load %arg3[%c0_4, %c0_5] : memref<32x2xf32, #tpu.memory_space<vmem>>, vector<32x2xf32>
    %cst_6 = arith.constant dense<0.000000e+00> : vector<64x2xf32>
    %12 = tpu.matmul %10, %11, %cst_6 {dimension_numbers = #tpu.dot_dimension_numbers<[1], [0], [0], [1], [0, 0, 1, 1], [], []>} : vector<64x32xf32>, vector<32x2xf32>, vector<64x2xf32> -> vector<64x2xf32>
    %13 = vector.shape_cast %12 : vector<64x2xf32> to vector<8x8x2xf32>
    %cst_7 = arith.constant dense<0xFF800000> : vector<8x2xf32>
    %14 = vector.multi_reduction <maximumf>, %13, %cst_7 [1] : vector<8x8x2xf32> to vector<8x2xf32>
    %15 = vector.shape_cast %14 : vector<8x2xf32> to vector<8x1x2xf32>
    %16 = vector.broadcast %15 : vector<8x1x2xf32> to vector<8x8x2xf32>
    %17 = arith.subf %13, %16 : vector<8x8x2xf32>
    %18 = math.exp %17 : vector<8x8x2xf32>
    %cst_8 = arith.constant dense<0.000000e+00> : vector<8x2xf32>
    %19 = vector.multi_reduction <add>, %18, %cst_8 [1] : vector<8x8x2xf32> to vector<8x2xf32>
    %20 = vector.shape_cast %19 : vector<8x2xf32> to vector<8x1x2xf32>
    %21 = tpu.reciprocal %20 {approx = true} : vector<8x1x2xf32> -> vector<8x1x2xf32>
    %22 = vector.broadcast %21 : vector<8x1x2xf32> to vector<8x8x2xf32>
    %23 = arith.mulf %18, %22 : vector<8x8x2xf32>
    %24 = vector.extract_strided_slice %23 {offsets = [0, 0, 0], sizes = [8, 8, 1], strides = [1, 1, 1]} : vector<8x8x2xf32> to vector<8x8x1xf32>
    %25 = vector.broadcast %24 : vector<8x8x1xf32> to vector<8x8x32xf32>
    %26 = arith.mulf %25, %9 : vector<8x8x32xf32>
    %cst_9 = arith.constant dense<0.000000e+00> : vector<8x32xf32>
    %27 = vector.multi_reduction <add>, %26, %cst_9 [1] : vector<8x8x32xf32> to vector<8x32xf32>
    %28 = vector.extract_strided_slice %23 {offsets = [0, 0, 1], sizes = [8, 8, 1], strides = [1, 1, 1]} : vector<8x8x2xf32> to vector<8x8x1xf32>
    %29 = vector.broadcast %28 : vector<8x8x1xf32> to vector<8x8x32xf32>
    %30 = arith.mulf %29, %9 : vector<8x8x32xf32>
    %cst_10 = arith.constant dense<0.000000e+00> : vector<8x32xf32>
    %31 = vector.multi_reduction <add>, %30, %cst_10 [1] : vector<8x8x32xf32> to vector<8x32xf32>
    %32 = arith.maximumf %27, %31 : vector<8x32xf32>
    %c0_11 = arith.constant 0 : index
    %c0_12 = arith.constant 0 : index
    %33 = vector.load %arg4[%c0_11, %c0_12] : memref<8x32xf32, #tpu.memory_space<vmem>>, vector<8x32xf32>
    tpu.vector_store %arg4[%c0_11, %c0_12], %32 {strides = array<i32>} : memref<8x32xf32, #tpu.memory_space<vmem>>, vector<8x32xf32>,
    return
  }
  func.func @transform_0(%arg0: i32) -> (i32, i32) {
    %c0_i32 = arith.constant 0 : i32
    %c0_i32_0 = arith.constant 0 : i32
    return %arg0, %c0_i32 : i32, i32
  }
  func.func @transform_1(%arg0: i32) -> (i32, i32, i32) {
    %c0_i32 = arith.constant 0 : i32
    %c0_i32_0 = arith.constant 0 : i32
    %c0_i32_1 = arith.constant 0 : i32
    return %arg0, %c0_i32, %c0_i32_0 : i32, i32, i32
  }
  func.func @transform_2(%arg0: i32) -> (i32, i32) {
    %c0_i32 = arith.constant 0 : i32
    %c0_i32_0 = arith.constant 0 : i32
    %c0_i32_1 = arith.constant 0 : i32
    return %c0_i32, %c0_i32_0 : i32, i32
  }
  func.func @transform_3(%arg0: i32) -> (i32, i32) {
    %c0_i32 = arith.constant 0 : i32
    %c0_i32_0 = arith.constant 0 : i32
    return %arg0, %c0_i32 : i32, i32
  }
}

</mosaic_0001>

<bundles_post_ra>
// kernel: tpu_custom_call.1
= control target key start
LH: loop header
LB: loop body
LE: loop exit
PB: predicated region body
PF: predicated region fallthrough
CT: control target
= control target key end

     0   :  { %8 = vsyncpa [#allocation3], 0  ;;  %s1065_s0 = inlined_call_operand.vmem [shape: s32[8,1], index: 0, kind: input, shape index: {}]   ;;  %s1066_s1 = inlined_call_operand.hbm [shape: f32[8,8,32], index: 1, kind: input, shape index: {}]   ;;  %s1067_s2 = inlined_call_operand.vmem [shape: f32[32,2], index: 2, kind: input, shape index: {}]   ;;  %s1068_s3 = inlined_call_operand.hbm [shape: f32[8,32], index: 3, kind: output, shape index: {}]  }
   0x1   :  { %9 = vsyncpa [#allocation4], 0  ;;  %s856_s12 = smov [#allocation2]   ;;  %s808_s16 = scalar_lea.hbm %s1066_s1, 1024 }
   0x2   :  { %s17_s13 = sshll.u32 %s856_s12, 4  ;;  %p809_p0 = scmp.ne.s32.totalorder %s1066_s1, %s808_s16  ;;  %s18_s13 = int_to_ptr.vmem [resolvable:$true] %s17_s13 }
   0x3   :  { %p812_p1 = scmp.lt.u32.totalorder %s808_s16, %s1066_s1 }
   0x5   :  { %p814_p2 = pnand %p812_p1, %p809_p0 }
   0x7   :  { %817 = shalt.err (!%p814_p2)
}
   0x8   :  { %s818_s21 = scalar_lea.vmem %s18_s13, 1024  ;;  %p823_p4 = scmp.lt.s32.totalorder %s18_s13, %s18_s13 }
   0x9   :  { %p819_p3 = scmp.ne.s32.totalorder %s18_s13, %s818_s21  ;;  %p824_p5 = scmp.lt.s32.totalorder %s818_s21, %s818_s21 }
   0xb   :  { %p825_p6 = por %p824_p5, %p823_p4 }
   0xd   :  { %p826_p7 = pnand %p825_p6, %p819_p3 }
   0xf   :  { %829 = shalt.err (!%p826_p7)
}
  0x10   :  { %s857_s22 = smov 128   ;;  %s858_s23 = smov 8  }
  0x11   :  { %23 = dma.hbm_to_vmem [thread:$0]  %s1066_s1, 1024, %s18_s13, [#allocation3], %s857_s22, %s857_s22, %s858_s23  }
  0x12   :  { %852 = dma.done.wait [#allocation3], 1024  }
  0x13   :  { %853 = vsyncadd [#allocation3], 4294966272  ;;  %v38_v0 = vlaneseq  ;;  %v859_v1 = vmov 0   ;;  %v860_v2 = vmov 1966171168   ;;  %v37_v7 = vld [vmem:[%s1065_s0] sm:$0xff] }
  0x14   :  { %770 = vset.pattern.permute.xlu0 %v859_v1  ;;  %v42_v3 = vunpack.c.l.s4 %v860_v2  ;;  %771 = vset.pattern.permute.xlu1 %v859_v1  ;;  %v177_v8 = vld [vmem:[%s1067_s2] sm:$0xff]  ;;  %v178_v9 = vld [vmem:[%s1067_s2 + $0x8] sm:$0xff]  ;;  %v40_v12 = vcombine.high %v37_v7, %v37_v7  ;;  %v179_v29 = vld [vmem:[%s1067_s2 + $0x10] sm:$0xff]  ;;  %vm181_vm8 = vcmask 261120  }
  0x15   :  { %v39_v4 = vshrl.u32 %v38_v0, 7  ;;  %v751_v13 = vpack.c.bf16 %v178_v9, %v177_v8  ;;  %v180_v30 = vld [vmem:[%s1067_s2 + $0x18] sm:$0xff]  ;;  %v29_v44 = vld [vmem:[#allocation2] sm:$0xff]  ;;  %v31_v48 = vld [vmem:[#allocation2 + $0x10] sm:$0xff]  ;;  %s862_s2 = smov [#allocation5]  }
  0x16   :  { %v43_v5 = vunpack.c.0.s8 %v42_v3  ;;  %v755_v31 = vpack.c.bf16 %v180_v30, %v179_v29  ;;  %v30_v49 = vld [vmem:[#allocation2 + $0x8] sm:$0xff]  ;;  %v33_v52 = vld [vmem:[#allocation2 + $0x20] sm:$0xff]  ;;  %v32_v55 = vld [vmem:[#allocation2 + $0x18] sm:$0xff]  ;;  %s702_s7 = sshll.u32 %s862_s2, 4  ;;  %s703_s7 = int_to_ptr.vmem [resolvable:$true] %s702_s7 }
  0x17   :  { %v91_v11 = vsub.s32 0, %v39_v4  ;;  %752 = vmatprep.subr.bf16.mxu0 %v751_v13  ;;  %759 = vmatprep.subr.bf16.mxu1 %v751_v13  ;;  %v34_v58 = vld [vmem:[#allocation2 + $0x28] sm:$0xff]  ;;  %v35_v61 = vld [vmem:[#allocation2 + $0x30] sm:$0xff]  ;;  %v36_v0 = vld [vmem:[#allocation2 + $0x38] sm:$0xff]  ;;  %s830_s8 = scalar_lea.vmem %s703_s7, 128  ;;  %p835_p9 = scmp.lt.s32.totalorder %s703_s7, %s703_s7 }
  0x18   :  { %v46_v6 = vsub.s32 %v43_v5, %v39_v4  ;;  %754 = vmatpush3.bf16.msra.mxu0 %v751_v13  ;;  %761 = vmatpush3.bf16.msra.mxu1 %v751_v13  ;;  %p831_p8 = scmp.ne.s32.totalorder %s703_s7, %s830_s8  ;;  %p836_p10 = scmp.lt.s32.totalorder %s830_s8, %s830_s8 }
  0x19   :  { %756 = vmatprep.subr.bf16.mxu0 %v755_v31  ;;  %760 = vmatprep.subr.bf16.mxu1 %v755_v31 }
  0x1a   :  { %v47_v10 = vrot.slane %v37_v7, %v46_v6  ;;  %v54_v16 = vrot.slane %v40_v12, %v46_v6  ;;  %p837_p11 = por %p836_p10, %p835_p9 }
  0x1c   :  { %v63_v14 = vrot.slane %v47_v10, %v46_v6  ;;  %v55_v15 = vcombine.high %v47_v10, %v47_v10  ;;  %v70_v20 = vrot.slane %v54_v16, %v46_v6  ;;  %v56_v21 = vcombine.high %v54_v16, %v54_v16  ;;  %758 = vmatpush3.bf16.msra.mxu0 %v755_v31  ;;  %p838_p12 = pnand %p837_p11, %p831_p8 }
  0x1d   :  { %762 = vmatpush3.bf16.msra.mxu1 %v755_v31 }
  0x1e   :  { %v92_v17 = vrot.slane %v63_v14, %v91_v11  ;;  %v85_v18 = vcombine.high %v63_v14, %v63_v14  ;;  %v77_v19 = vrot.slane %v55_v15, %v46_v6  ;;  %v108_v24 = vrot.slane %v70_v20, %v91_v11 }
  0x1f   :  { %v84_v27 = vrot.slane %v56_v21, %v46_v6  ;;  %v86_v28 = vcombine.high %v70_v20, %v70_v20 }
  0x20   :  { %vm121_vm0 = vcmp.lt.s32.totalorder %v39_v4, %v92_v17  ;;  %v100_v22 = vrot.slane %v85_v18, %v91_v11  ;;  %v96_v23 = vrot.slane %v77_v19, %v91_v11  ;;  %v87_v26 = vcombine.high %v77_v19, %v77_v19 }
  0x21   :  { %v129_v25 = vsel %vm121_vm0, 1, %v859_v1  ;;  %vm125_vm3 = vcmp.lt.s32.totalorder %v39_v4, %v108_v24  ;;  %v112_v35 = vrot.slane %v84_v27, %v91_v11  ;;  %v116_v36 = vrot.slane %v86_v28, %v91_v11 }
  0x22   :  { %138 = vperm.xlu0 %770, %v129_v25   ;;  %vm123_vm1 = vcmp.lt.s32.totalorder %v39_v4, %v100_v22  ;;  %vm122_vm2 = vcmp.lt.s32.totalorder %v39_v4, %v96_v23  ;;  %v104_v34 = vrot.slane %v87_v26, %v91_v11  ;;  %v88_v37 = vcombine.high %v84_v27, %v84_v27 }
  0x23   :  { %v131_v32 = vsel %vm123_vm1, 1, %v859_v1  ;;  %v130_v33 = vsel %vm122_vm2, 1, %v859_v1  ;;  %v133_v38 = vsel %vm125_vm3, 1, %v859_v1  ;;  %vm126_vm5 = vcmp.lt.s32.totalorder %v39_v4, %v112_v35 }
  0x24   :  { %144 = vperm.xlu1 %771, %v131_v32   ;;  %vm124_vm4 = vcmp.lt.s32.totalorder %v39_v4, %v104_v34  ;;  %v120_v39 = vrot.slane %v88_v37, %v91_v11  ;;  %vm127_vm6 = vcmp.lt.s32.totalorder %v39_v4, %v116_v36  ;;  %v134_v41 = vsel %vm126_vm5, 1, %v859_v1 }
  0x25   :  { %v132_v40 = vsel %vm124_vm4, 1, %v859_v1  ;;  %v135_v42 = vsel %vm127_vm6, 1, %v859_v1  ;;  %vm311_vm1 = vcmask 15360   ;;  %vm680_vm2 = vcmask 1041409  }
  0x26   :  { %141 = vperm.xlu0 %770, %v130_v33   ;;  %vm128_vm7 = vcmp.lt.s32.totalorder %v39_v4, %v120_v39  ;;  %vm682_vm3 = vcmask 1042434   ;;  %vm684_vm4 = vcmask 1043459   ;;  %vm686_vm5 = vcmask 1044484  }
  0x27   :  { %v136_v43 = vsel %vm128_vm7, 1, %v859_v1  ;;  %vm688_vm6 = vcmask 1045509   ;;  %vm690_vm7 = vcmask 1046534  }
  0x28   :  { %150 = vperm.xlu1 %771, %v133_v38  }
  0x2a   :  { %147 = vperm.xlu0 %770, %v132_v40  }
  0x2c   :  { %153 = vperm.xlu1 %771, %v134_v41  }
  0x2e   :  { %156 = vperm.xlu0 %770, %v135_v42  }
  0x30   :  { %159 = vperm.xlu1 %771, %v136_v43  }
  0xa1   :  { %v139_v45 = vpop.permute.xlu0 %138 }
  0xa2   :  { %vm161_vm9 = vcmp.eq.s32.totalorder %v139_v45, 1 }
  0xa3   :  { %v920_v46 = vsel %vm161_vm9, %v29_v44, 0.0  ;;  %v145_v47 = vpop.permute.xlu1 %144  ;;  %vm692_vm9 = vcmask 1047559  }
  0xa4   :  { %vm163_vm10 = vcmp.eq.s32.totalorder %v145_v47, 1  ;;  %739 = vmatprep.mubr.msk.f32.mxu0 %vm181_vm8, %v920_v46 }
  0xa5   :  { %v142_v50 = vpop.permute.xlu0 %141  ;;  %v924_v51 = vsel %vm163_vm10, %v31_v48, 0.0 }
  0xa6   :  { %vm162_vm11 = vcmp.eq.s32.totalorder %v142_v50, 1 }
  0xa7   :  { %v926_v53 = vsel %vm162_vm11, %v30_v49, 0.0  ;;  %v151_v54 = vpop.permute.xlu1 %150 }
  0xa8   :  { %vm165_vm12 = vcmp.eq.s32.totalorder %v151_v54, 1  ;;  %740 = vmatmul.mubr.msk.f32.vlgmr.msra.gmra.mrb[0].mxu0 %vm181_vm8, %v926_v53 }
  0xa9   :  { %v930_v56 = vsel %vm165_vm12, %v33_v52, 0.0  ;;  %v148_v57 = vpop.permute.xlu0 %147  ;;  %742 = vmatprep.mubr.msk.f32.mxu0 %vm181_vm8, %v924_v51 }
  0xaa   :  { %vm164_vm13 = vcmp.eq.s32.totalorder %v148_v57, 1  ;;  %745 = vmatprep.mubr.msk.f32.mxu1 %vm181_vm8, %v930_v56 }
  0xab   :  { %v936_v59 = vsel %vm164_vm13, %v32_v55, 0.0  ;;  %v154_v60 = vpop.permute.xlu1 %153 }
  0xac   :  { %vm166_vm14 = vcmp.eq.s32.totalorder %v154_v60, 1  ;;  %743 = vmatmul.mubr.msk.f32.gmra.mrb[2].mxu0 %vm181_vm8, %v936_v59 }
  0xad   :  { %v940_v62 = vsel %vm166_vm14, %v34_v58, 0.0  ;;  %v157_v63 = vpop.permute.xlu0 %156 }
  0xae   :  { %vm167_vm15 = vcmp.eq.s32.totalorder %v157_v63, 1  ;;  %746 = vmatmul.mubr.msk.f32.vlgmr.msra.gmra.mrb[0].mxu1 %vm181_vm8, %v940_v62 }
  0xaf   :  { %v944_v2 = vsel %vm167_vm15, %v35_v61, 0.0  ;;  %v160_v3 = vpop.permute.xlu1 %159 }
  0xb0   :  { %vm168_vm0 = vcmp.eq.s32.totalorder %v160_v3, 1  ;;  %748 = vmatprep.mubr.msk.f32.mxu1 %vm181_vm8, %v944_v2 }
  0xb1   :  { %v948_v4 = vsel %vm168_vm0, %v36_v0, 0.0 }
  0xb2   :  { %749 = vmatmul.mubr.msk.f32.gmra.mrb[2].mxu1 %vm181_vm8, %v948_v4 }
 0x17b   :  { %v741_v5 = vpop.f32.mrb[0].mxu0 }
 0x17c   :  { %v319_v6 = vsel %vm311_vm1, %v741_v5, -inf  ;;  %v272_v7 = vpop.f32.mrb[1].mxu0 }
 0x17d   :  { %v320_v8 = vrot.slane %v319_v6, 4  ;;  %v312_v9 = vsel %vm311_vm1, %v272_v7, -inf }
 0x17e   :  { %v313_v10 = vrot.slane %v312_v9, 4 }
 0x17f   :  { %v321_v11 = vmax.f32 %v319_v6, %v320_v8  ;;  %v744_v12 = vpop.f32.mrb[2].mxu0 }
 0x180   :  { %v314_v13 = vmax.f32 %v312_v9, %v313_v10  ;;  %v333_v14 = vsel %vm311_vm1, %v744_v12, -inf  ;;  %v282_v15 = vpop.f32.mrb[3].mxu0 }
 0x181   :  { %v322_v16 = vrot.slane %v321_v11, 2  ;;  %v334_v17 = vrot.slane %v333_v14, 4  ;;  %v326_v18 = vsel %vm311_vm1, %v282_v15, -inf  ;;  %v747_v19 = vpop.f32.mrb[0].mxu1 }
 0x182   :  { %v315_v20 = vrot.slane %v314_v13, 2  ;;  %v327_v21 = vrot.slane %v326_v18, 4  ;;  %v347_v22 = vsel %vm311_vm1, %v747_v19, -inf  ;;  %v292_v23 = vpop.f32.mrb[1].mxu1 }
 0x183   :  { %v323_v24 = vmax.f32 %v321_v11, %v322_v16  ;;  %v335_v25 = vmax.f32 %v333_v14, %v334_v17  ;;  %v348_v26 = vrot.slane %v347_v22, 4  ;;  %v340_v27 = vsel %vm311_vm1, %v292_v23, -inf }
 0x184   :  { %v316_v28 = vmax.f32 %v314_v13, %v315_v20  ;;  %v328_v29 = vmax.f32 %v326_v18, %v327_v21  ;;  %v341_v30 = vrot.slane %v340_v27, 4 }
 0x185   :  { %v324_v31 = vrot.slane %v323_v24, 1  ;;  %v336_v32 = vrot.slane %v335_v25, 2  ;;  %v349_v33 = vmax.f32 %v347_v22, %v348_v26  ;;  %v750_v34 = vpop.f32.mrb[2].mxu1 }
 0x186   :  { %v317_v35 = vrot.slane %v316_v28, 1  ;;  %v329_v36 = vrot.slane %v328_v29, 2  ;;  %v342_v37 = vmax.f32 %v340_v27, %v341_v30  ;;  %v361_v38 = vsel %vm311_vm1, %v750_v34, -inf  ;;  %v302_v39 = vpop.f32.mrb[3].mxu1 }
 0x187   :  { %v325_v40 = vmax.f32 %v323_v24, %v324_v31  ;;  %v337_v41 = vmax.f32 %v335_v25, %v336_v32  ;;  %v350_v42 = vrot.slane %v349_v33, 2  ;;  %v362_v43 = vrot.slane %v361_v38, 4 }
 0x188   :  { %v318_v44 = vmax.f32 %v316_v28, %v317_v35  ;;  %v330_v45 = vmax.f32 %v328_v29, %v329_v36  ;;  %v343_v47 = vrot.slane %v342_v37, 2  ;;  %v354_v48 = vsel %vm311_vm1, %v302_v39, -inf }
 0x189   :  { %v369_v49 = vsub.f32 %v741_v5, %v325_v40  ;;  %v338_v50 = vrot.slane %v337_v41, 1  ;;  %v351_v52 = vmax.f32 %v349_v33, %v350_v42  ;;  %v363_v54 = vmax.f32 %v361_v38, %v362_v43 }
 0x18a   :  { %v368_v55 = vsub.f32 %v272_v7, %v318_v44  ;;  %v331_v57 = vrot.slane %v330_v45, 1  ;;  %v344_v58 = vmax.f32 %v342_v37, %v343_v47  ;;  %v355_v60 = vrot.slane %v354_v48, 4 }
 0x18b   :  { %v378_v61 = vmul.f32 1.442695, %v369_v49  ;;  %v339_v63 = vmax.f32 %v337_v41, %v338_v50  ;;  %v352_v0 = vrot.slane %v351_v52, 1  ;;  %v364_v3 = vrot.slane %v363_v54, 2 }
 0x18c   :  { %v376_v6 = vmul.f32 1.442695, %v368_v55  ;;  %v332_v8 = vmax.f32 %v330_v45, %v331_v57  ;;  %v345_v9 = vrot.slane %v344_v58, 1  ;;  %v356_v10 = vmax.f32 %v354_v48, %v355_v60 }
 0x18d   :  { %776 = vpow2.f32 %v378_v61  ;;  %v371_v11 = vsub.f32 %v744_v12, %v339_v63  ;;  %v353_v13 = vmax.f32 %v351_v52, %v352_v0  ;;  %v365_v14 = vmax.f32 %v363_v54, %v364_v3 }
 0x18e   :  { %778 = vpow2.f32 %v376_v6  ;;  %v370_v5 = vsub.f32 %v282_v15, %v332_v8  ;;  %v346_v16 = vmax.f32 %v344_v58, %v345_v9  ;;  %v357_v17 = vrot.slane %v356_v10, 2 }
 0x18f   :  { %v382_v7 = vmul.f32 1.442695, %v371_v11  ;;  %v373_v18 = vsub.f32 %v747_v19, %v353_v13  ;;  %v366_v20 = vrot.slane %v365_v14, 1 }
 0x190   :  { %v380_v21 = vmul.f32 1.442695, %v370_v5  ;;  %v372_v22 = vsub.f32 %v292_v23, %v346_v16  ;;  %v358_v24 = vmax.f32 %v356_v10, %v357_v17 }
 0x191   :  { %780 = vpow2.f32 %v382_v7  ;;  %v386_v25 = vmul.f32 1.442695, %v373_v18  ;;  %v367_v26 = vmax.f32 %v365_v14, %v366_v20 }
 0x192   :  { %782 = vpow2.f32 %v380_v21  ;;  %v384_v27 = vmul.f32 1.442695, %v372_v22  ;;  %v359_v28 = vrot.slane %v358_v24, 1 }
 0x193   :  { %784 = vpow2.f32 %v386_v25  ;;  %v375_v12 = vsub.f32 %v750_v34, %v367_v26 }
 0x194   :  { %786 = vpow2.f32 %v384_v27  ;;  %v360_v29 = vmax.f32 %v358_v24, %v359_v28 }
 0x195   :  { %v390_v30 = vmul.f32 1.442695, %v375_v12 }
 0x196   :  { %v374_v15 = vsub.f32 %v302_v39, %v360_v29 }
 0x197   :  { %v960_v31 = vpop.eup %776  ;;  %788 = vpow2.f32 %v390_v30 }
 0x198   :  { %v962_v32 = vpop.eup %778  ;;  %v399_v19 = vsel %vm311_vm1, %v960_v31, 0.0  ;;  %v388_v23 = vmul.f32 1.442695, %v374_v15 }
 0x199   :  { %v400_v33 = vrot.slane %v399_v19, 4  ;;  %v392_v35 = vsel %vm311_vm1, %v962_v32, 0.0 }
 0x19a   :  { %v393_v36 = vrot.slane %v392_v35, 4  ;;  %790 = vpow2.f32 %v388_v23 }
 0x19b   :  { %v968_v34 = vpop.eup %780  ;;  %v401_v37 = vadd.f32 %v400_v33, %v399_v19 }
 0x19c   :  { %v970_v38 = vpop.eup %782  ;;  %v394_v39 = vadd.f32 %v393_v36, %v392_v35  ;;  %v413_v40 = vsel %vm311_vm1, %v968_v34, 0.0 }
 0x19d   :  { %v974_v41 = vpop.eup %784  ;;  %v402_v42 = vrot.slane %v401_v37, 2  ;;  %v414_v43 = vrot.slane %v413_v40, 4  ;;  %v406_v44 = vsel %vm311_vm1, %v970_v38, 0.0 }
 0x19e   :  { %v978_v45 = vpop.eup %786  ;;  %v395_v47 = vrot.slane %v394_v39, 2  ;;  %v427_v48 = vsel %vm311_vm1, %v974_v41, 0.0  ;;  %v407_v57 = vrot.slane %v406_v44, 4 }
 0x19f   :  { %v403_v49 = vadd.f32 %v402_v42, %v401_v37  ;;  %v428_v50 = vrot.slane %v427_v48, 4  ;;  %v420_v52 = vsel %vm311_vm1, %v978_v45, 0.0  ;;  %v415_v55 = vadd.f32 %v414_v43, %v413_v40 }
 0x1a0   :  { %v396_v54 = vadd.f32 %v395_v47, %v394_v39  ;;  %v421_v58 = vrot.slane %v420_v52, 4  ;;  %v408_v11 = vadd.f32 %v407_v57, %v406_v44  ;;  %v861_v47 = vmov 1  }
 0x1a1   :  { %v429_v60 = vadd.f32 %v428_v50, %v427_v48  ;;  %v404_v61 = vrot.slane %v403_v49, 1  ;;  %v984_v63 = vpop.eup %788  ;;  %v416_v10 = vrot.slane %v415_v55, 2 }
 0x1a2   :  { %v422_v0 = vadd.f32 %v421_v58, %v420_v52  ;;  %v397_v3 = vrot.slane %v396_v54, 1  ;;  %v441_v16 = vsel %vm311_vm1, %v984_v63, 0.0  ;;  %v409_v21 = vrot.slane %v408_v11, 2 }
 0x1a3   :  { %v430_v6 = vrot.slane %v429_v60, 2  ;;  %v405_v8 = vadd.f32 %v404_v61, %v403_v49  ;;  %v442_v22 = vrot.slane %v441_v16, 4  ;;  %v417_v24 = vadd.f32 %v416_v10, %v415_v55 }
 0x1a4   :  { %v986_v9 = vpop.eup %790  ;;  %v423_v13 = vrot.slane %v422_v0, 2  ;;  %v398_v14 = vadd.f32 %v397_v3, %v396_v54  ;;  %v410_v28 = vadd.f32 %v409_v21, %v408_v11 }
 0x1a5   :  { %v431_v5 = vadd.f32 %v430_v6, %v429_v60  ;;  %v434_v17 = vsel %vm311_vm1, %v986_v9, 0.0  ;;  %792 = vrcp.f32 %v405_v8  ;;  %v443_v12 = vadd.f32 %v442_v22, %v441_v16 }
 0x1a6   :  { %v424_v7 = vadd.f32 %v423_v13, %v422_v0  ;;  %v435_v18 = vrot.slane %v434_v17, 4  ;;  %794 = vrcp.f32 %v398_v14  ;;  %v418_v15 = vrot.slane %v417_v24, 1 }
 0x1a7   :  { %v432_v20 = vrot.slane %v431_v5, 1  ;;  %v444_v33 = vrot.slane %v443_v12, 2  ;;  %v411_v36 = vrot.slane %v410_v28, 1 }
 0x1a8   :  { %v436_v25 = vadd.f32 %v435_v18, %v434_v17  ;;  %v425_v27 = vrot.slane %v424_v7, 1  ;;  %v419_v40 = vadd.f32 %v418_v15, %v417_v24 }
 0x1a9   :  { %v433_v26 = vadd.f32 %v432_v20, %v431_v5  ;;  %v445_v42 = vadd.f32 %v444_v33, %v443_v12  ;;  %v412_v43 = vadd.f32 %v411_v36, %v410_v28 }
 0x1aa   :  { %v437_v29 = vrot.slane %v436_v25, 2  ;;  %v426_v30 = vadd.f32 %v425_v27, %v424_v7 }
 0x1ab   :  { %796 = vrcp.f32 %v433_v26  ;;  %v446_v49 = vrot.slane %v445_v42, 1 }
 0x1ac   :  { %v438_v37 = vadd.f32 %v437_v29, %v436_v25  ;;  %798 = vrcp.f32 %v426_v30 }
 0x1ad   :  { %800 = vrcp.f32 %v419_v40  ;;  %v447_v52 = vadd.f32 %v446_v49, %v445_v42 }
 0x1ae   :  { %v439_v44 = vrot.slane %v438_v37, 1  ;;  %802 = vrcp.f32 %v412_v43 }
 0x1af   :  { %v793_v19 = vpop.eup %792 }
 0x1b0   :  { %v795_v23 = vpop.eup %794  ;;  %v457_v35 = vmul.f32 %v793_v19, %v960_v31  ;;  %v440_v31 = vadd.f32 %v439_v44, %v438_v37 }
 0x1b1   :  { %v456_v39 = vmul.f32 %v795_v23, %v962_v32 }
 0x1b2   :  { %471 = vperm.xlu1 %771, %v457_v35   ;;  %804 = vrcp.f32 %v440_v31 }
 0x1b3   :  { %466 = vperm.xlu0 %770, %v456_v39   ;;  %806 = vrcp.f32 %v447_v52 }
 0x1b5   :  { %v797_v48 = vpop.eup %796 }
 0x1b6   :  { %772 = vset.pattern.permute.xlu1 %v861_v47  ;;  %v461_v50 = vmul.f32 %v797_v48, %v974_v41  ;;  %v799_v32 = vpop.eup %798 }
 0x1b7   :  { %573 = vperm.xlu1 %772, %v457_v35   ;;  %773 = vset.pattern.permute.xlu0 %v861_v47  ;;  %v460_v54 = vmul.f32 %v799_v32, %v978_v45  ;;  %v801_v55 = vpop.eup %800 }
 0x1b8   :  { %569 = vperm.xlu0 %773, %v456_v39   ;;  %v459_v57 = vmul.f32 %v801_v55, %v968_v34  ;;  %v803_v58 = vpop.eup %802 }
 0x1b9   :  { %v458_v41 = vmul.f32 %v803_v58, %v970_v38 }
 0x1bb   :  { %774 = vset.pattern.permute.xlu1 %v859_v1 }
 0x1bc   :  { %491 = vperm.xlu1 %774, %v461_v50   ;;  %589 = vperm.xlu0 %773, %v461_v50   ;;  %v805_v60 = vpop.eup %804 }
 0x1bd   :  { %v462_v1 = vmul.f32 %v805_v60, %v986_v9  ;;  %v807_v61 = vpop.eup %806 }
 0x1be   :  { %v463_v45 = vmul.f32 %v807_v61, %v984_v63 }
 0x1c0   :  { %486 = vperm.xlu1 %774, %v460_v54   ;;  %585 = vperm.xlu0 %773, %v460_v54  }
 0x1c4   :  { %581 = vperm.xlu0 %773, %v459_v57   ;;  %481 = vperm.xlu1 %774, %v459_v57  }
 0x1c8   :  { %577 = vperm.xlu0 %773, %v458_v41   ;;  %476 = vperm.xlu1 %774, %v458_v41  }
 0x1cc   :  { %593 = vperm.xlu0 %773, %v462_v1   ;;  %496 = vperm.xlu1 %774, %v462_v1  }
 0x1d0   :  { %597 = vperm.xlu0 %773, %v463_v45   ;;  %501 = vperm.xlu1 %774, %v463_v45  }
 0x231   :  { %v472_v0 = vpop.permute.xlu1 %471 }
 0x232   :  { %v505_v34 = vmul.f32 %v472_v0, %v926_v53  ;;  %v467_v3 = vpop.permute.xlu0 %466 }
 0x233   :  { %v504_v6 = vmul.f32 %v467_v3, %v920_v46 }
 0x234   :  { %v519_v38 = vsel %vm181_vm8, %v505_v34, 0.0 }
 0x235   :  { %v520_v8 = vrot.slane %v519_v38, 4  ;;  %v512_v10 = vsel %vm181_vm8, %v504_v6, 0.0 }
 0x236   :  { %v513_v11 = vrot.slane %v512_v10, 4  ;;  %v574_v9 = vpop.permute.xlu1 %573 }
 0x237   :  { %v601_v13 = vmul.f32 %v574_v9, %v926_v53  ;;  %v570_v14 = vpop.permute.xlu0 %569  ;;  %v521_v5 = vadd.f32 %v520_v8, %v519_v38 }
 0x238   :  { %v600_v63 = vmul.f32 %v570_v14, %v920_v46  ;;  %v514_v16 = vadd.f32 %v513_v11, %v512_v10 }
 0x239   :  { %v615_v17 = vsel %vm181_vm8, %v601_v13, 0.0  ;;  %v522_v24 = vrot.slane %v521_v5, 2 }
 0x23a   :  { %v616_v7 = vrot.slane %v615_v17, 4  ;;  %v608_v18 = vsel %vm181_vm8, %v600_v63, 0.0  ;;  %v515_v53 = vrot.slane %v514_v16, 2 }
 0x23b   :  { %v609_v20 = vrot.slane %v608_v18, 4  ;;  %v492_v21 = vpop.permute.xlu1 %491  ;;  %v590_v22 = vpop.permute.xlu0 %589  ;;  %v523_v35 = vadd.f32 %v522_v24, %v521_v5 }
 0x23c   :  { %v617_v25 = vadd.f32 %v616_v7, %v615_v17  ;;  %v509_v26 = vmul.f32 %v492_v21, %v940_v62  ;;  %v605_v27 = vmul.f32 %v590_v22, %v940_v62  ;;  %v516_v39 = vadd.f32 %v515_v53, %v514_v16 }
 0x23d   :  { %v610_v28 = vadd.f32 %v609_v20, %v608_v18  ;;  %v524_v50 = vrot.slane %v523_v35, 1 }
 0x23e   :  { %v618_v12 = vrot.slane %v617_v25, 2  ;;  %v547_v46 = vsel %vm181_vm8, %v509_v26, 0.0  ;;  %v643_v29 = vsel %vm181_vm8, %v605_v27, 0.0  ;;  %v517_v55 = vrot.slane %v516_v39, 1 }
 0x23f   :  { %v611_v30 = vrot.slane %v610_v28, 2  ;;  %v548_v15 = vrot.slane %v547_v46, 4  ;;  %v644_v19 = vrot.slane %v643_v29, 4  ;;  %v487_v23 = vpop.permute.xlu1 %486  ;;  %v586_v33 = vpop.permute.xlu0 %585  ;;  %v1022_v10 = vadd.f32 %v524_v50, %v523_v35 }
 0x240   :  { %v508_v36 = vmul.f32 %v487_v23, %v930_v56  ;;  %v604_v37 = vmul.f32 %v586_v33, %v930_v56  ;;  %v619_v40 = vadd.f32 %v618_v12, %v617_v25 }
 0x241   :  { %v612_v62 = vadd.f32 %v611_v30, %v610_v28  ;;  %v549_v42 = vadd.f32 %v548_v15, %v547_v46  ;;  %v645_v47 = vadd.f32 %v644_v19, %v643_v29 }
 0x242   :  { %v540_v43 = vsel %vm181_vm8, %v508_v36, 0.0  ;;  %v636_v44 = vsel %vm181_vm8, %v604_v37, 0.0  ;;  %v620_v56 = vrot.slane %v619_v40, 1 }
 0x243   :  { %v541_v48 = vrot.slane %v540_v43, 4  ;;  %v582_v31 = vpop.permute.xlu0 %581  ;;  %v482_v49 = vpop.permute.xlu1 %481  ;;  %v637_v32 = vrot.slane %v636_v44, 4  ;;  %v613_v57 = vrot.slane %v612_v62, 1  ;;  %v550_v41 = vrot.slane %v549_v42, 2 }
 0x244   :  { %v603_v52 = vmul.f32 %v582_v31, %v936_v59  ;;  %v507_v54 = vmul.f32 %v482_v49, %v936_v59  ;;  %v646_v61 = vrot.slane %v645_v47, 2  ;;  %v1024_v59 = vadd.f32 %v517_v55, %v516_v39 }
 0x245   :  { %v542_v58 = vadd.f32 %v541_v48, %v540_v43  ;;  %v638_v45 = vadd.f32 %v637_v32, %v636_v44  ;;  %v1026_v11 = vadd.f32 %v620_v56, %v619_v40  ;;  %v1028_v9 = vadd.f32 %v613_v57, %v612_v62 }
 0x246   :  { %v629_v60 = vsel %vm181_vm8, %v603_v52, 0.0  ;;  %v533_v1 = vsel %vm181_vm8, %v507_v54, 0.0  ;;  %v551_v13 = vadd.f32 %v550_v41, %v549_v42  ;;  %v1031_v16 = vadd.f32 %v646_v61, %v645_v47 }
 0x247   :  { %v578_v0 = vpop.permute.xlu0 %577  ;;  %v477_v34 = vpop.permute.xlu1 %476  ;;  %v543_v3 = vrot.slane %v542_v58, 2  ;;  %v630_v6 = vrot.slane %v629_v60, 4  ;;  %v534_v38 = vrot.slane %v533_v1, 4  ;;  %v639_v17 = vrot.slane %v638_v45, 2 }
 0x248   :  { %v602_v8 = vmul.f32 %v578_v0, %v924_v51  ;;  %v506_v18 = vmul.f32 %v477_v34, %v924_v51  ;;  %v665_v27 = vmax.f32 %v1022_v10, %v1026_v11  ;;  %v664_v46 = vmax.f32 %v1024_v59, %v1028_v9 }
 0x249   :  { %v631_v14 = vadd.f32 %v630_v6, %v629_v60  ;;  %v535_v5 = vadd.f32 %v534_v38, %v533_v1  ;;  %v544_v22 = vadd.f32 %v543_v3, %v542_v58  ;;  %v552_v15 = vrot.slane %v551_v13, 1 }
 0x24a   :  { %v622_v63 = vsel %vm181_vm8, %v602_v8, 0.0  ;;  %v526_v28 = vsel %vm181_vm8, %v506_v18, 0.0  ;;  %v648_v37 = vrot.slane %v1031_v16, 1  ;;  %v640_v40 = vadd.f32 %v639_v17, %v638_v45 }
 0x24b   :  { %v623_v7 = vrot.slane %v622_v63, 4  ;;  %v594_v20 = vpop.permute.xlu0 %593  ;;  %v497_v21 = vpop.permute.xlu1 %496  ;;  %v632_v24 = vrot.slane %v631_v14, 2  ;;  %v536_v25 = vrot.slane %v535_v5, 2  ;;  %v527_v30 = vrot.slane %v526_v28, 4 }
 0x24c   :  { %v606_v26 = vmul.f32 %v594_v20, %v944_v2  ;;  %v510_v12 = vmul.f32 %v497_v21, %v944_v2  ;;  %v545_v39 = vrot.slane %v544_v22, 1  ;;  %v641_v55 = vrot.slane %v640_v40, 1 }
 0x24d   :  { %v624_v53 = vadd.f32 %v623_v7, %v622_v63  ;;  %v633_v29 = vadd.f32 %v632_v24, %v631_v14  ;;  %v537_v51 = vadd.f32 %v536_v25, %v535_v5  ;;  %v528_v2 = vadd.f32 %v527_v30, %v526_v28 }
 0x24e   :  { %v650_v23 = vsel %vm181_vm8, %v606_v26, 0.0  ;;  %v554_v33 = vsel %vm181_vm8, %v510_v12, 0.0  ;;  %v553_v41 = vadd.f32 %v552_v15, %v551_v13  ;;  %v546_v10 = vadd.f32 %v545_v39, %v544_v22 }
 0x24f   :  { %v625_v19 = vrot.slane %v624_v53, 2  ;;  %v598_v35 = vpop.permute.xlu0 %597  ;;  %v502_v36 = vpop.permute.xlu1 %501  ;;  %v651_v42 = vrot.slane %v650_v23, 4  ;;  %v555_v43 = vrot.slane %v554_v33, 4  ;;  %v634_v47 = vrot.slane %v633_v29, 1 }
 0x250   :  { %v607_v44 = vmul.f32 %v598_v35, %v948_v4  ;;  %v538_v48 = vrot.slane %v537_v51, 1  ;;  %v529_v31 = vrot.slane %v528_v2, 2  ;;  %v511_v49 = vmul.f32 %v502_v36, %v948_v4 }
 0x251   :  { %v626_v62 = vadd.f32 %v625_v19, %v624_v53  ;;  %v652_v32 = vadd.f32 %v651_v42, %v650_v23  ;;  %v556_v52 = vadd.f32 %v555_v43, %v554_v33  ;;  %v635_v45 = vadd.f32 %v634_v47, %v633_v29 }
 0x252   :  { %v657_v54 = vsel %vm181_vm8, %v607_v44, 0.0  ;;  %v530_v56 = vadd.f32 %v529_v31, %v528_v2  ;;  %v561_v58 = vsel %vm181_vm8, %v511_v49, 0.0  ;;  %v539_v4 = vadd.f32 %v538_v48, %v537_v51 }
 0x253   :  { %v627_v50 = vrot.slane %v626_v62, 1  ;;  %v658_v57 = vrot.slane %v657_v54, 4  ;;  %v653_v60 = vrot.slane %v652_v32, 2  ;;  %v557_v1 = vrot.slane %v556_v52, 2 }
 0x254   :  { %v562_v61 = vrot.slane %v561_v58, 4  ;;  %v531_v34 = vrot.slane %v530_v56, 1  ;;  %v642_v59 = vadd.f32 %v641_v55, %v640_v40  ;;  %v649_v14 = vadd.f32 %v648_v37, %v1031_v16 }
 0x255   :  { %v628_v0 = vadd.f32 %v627_v50, %v626_v62  ;;  %v659_v3 = vadd.f32 %v658_v57, %v657_v54  ;;  %v654_v6 = vadd.f32 %v653_v60, %v652_v32  ;;  %v558_v38 = vadd.f32 %v557_v1, %v556_v52 }
 0x256   :  { %v563_v8 = vadd.f32 %v562_v61, %v561_v58  ;;  %v532_v11 = vadd.f32 %v531_v34, %v530_v56  ;;  %v681_v17 = vsel %vm680_vm2, %v665_v27, %v664_v46  ;;  %v667_v20 = vmax.f32 %v539_v4, %v635_v45 }
 0x257   :  { %v660_v9 = vrot.slane %v659_v3, 2  ;;  %v655_v5 = vrot.slane %v654_v6, 1  ;;  %v559_v63 = vrot.slane %v558_v38, 1  ;;  %v668_v26 = vmax.f32 %v546_v10, %v642_v59 }
 0x258   :  { %v564_v13 = vrot.slane %v563_v8, 2  ;;  %v666_v7 = vmax.f32 %v532_v11, %v628_v0  ;;  %v669_v28 = vmax.f32 %v553_v41, %v649_v14 }
 0x259   :  { %v661_v18 = vadd.f32 %v660_v9, %v659_v3  ;;  %v656_v21 = vadd.f32 %v655_v5, %v654_v6  ;;  %v560_v24 = vadd.f32 %v559_v63, %v558_v38 }
 0x25a   :  { %v565_v25 = vadd.f32 %v564_v13, %v563_v8  ;;  %v683_v22 = vsel %vm682_vm3, %v666_v7, %v681_v17 }
 0x25b   :  { %v662_v53 = vrot.slane %v661_v18, 1  ;;  %v685_v16 = vsel %vm684_vm4, %v667_v20, %v683_v22  ;;  %v670_v29 = vmax.f32 %v560_v24, %v656_v21 }
 0x25c   :  { %v566_v12 = vrot.slane %v565_v25, 1  ;;  %v687_v30 = vsel %vm686_vm5, %v668_v26, %v685_v16 }
 0x25d   :  { %v663_v51 = vadd.f32 %v662_v53, %v661_v18  ;;  %v689_v46 = vsel %vm688_vm6, %v669_v28, %v687_v30 }
 0x25e   :  { %v567_v27 = vadd.f32 %v566_v12, %v565_v25  ;;  %v691_v19 = vsel %vm690_vm7, %v670_v29, %v689_v46 }
 0x260   :  { %v671_v15 = vmax.f32 %v567_v27, %v663_v51 }
 0x262   :  { %v693_v23 = vsel %vm692_vm9, %v671_v15, %v691_v19 }
 0x263   :  { %695 = vst.msk [vmem:[#allocation5] sm:$0xff] %vm181_vm8, %v693_v23 }
 0x264   :  { %841 = shalt.err (!%p838_p12)
}
 0x265   :  { %s842_s11 = scalar_lea.hbm %s1068_s3, 128 }
 0x266   :  { %p843_p13 = scmp.ne.s32.totalorder %s1068_s3, %s842_s11  ;;  %p846_p0 = scmp.lt.u32.totalorder %s842_s11, %s1068_s3 }
 0x268   :  { %p848_p1 = pnand %p846_p0, %p843_p13 }
 0x26a   :  { %851 = shalt.err (!%p848_p1)
}
 0x26b   :  { %705 = dma.vmem_to_hbm [thread:$0]  %s703_s7, 128, %s1068_s3, [#allocation4]  }
 0x26c   :  { %854 = dma.done.wait [#allocation4], 128  }
 0x26d   :  { %855 = vsyncadd [#allocation4], 4294967168 }
 0x26e   :  { %709 = vsyncpa [#allocation3], 1 }
 0x26f   :  { %710 = vsyncpa [#allocation4], 1 }

</bundles_post_ra>
